<compile_context>
chip_gen: v5e
topology: v5e:2x2
jax: 0.10.0
libtpu: 0.0.40
codegen_flags: <defaults>
</compile_context>

<pallas_src>
import math

import jax
import jax.numpy as jnp
from jax.experimental import pallas as pl
from jax.experimental.pallas import tpu as pltpu

LANE = 128
SUBLANE = 8


# ----------------------------------------------------------------------------
# helpers
# ----------------------------------------------------------------------------
def _round_up(x, m):
    return (x + m - 1) // m * m


def _gelu_exact(x):
    # matches torch.nn.GELU() default (erf formulation)
    return 0.5 * x * (1.0 + jax.lax.erf(x * (1.0 / math.sqrt(2.0))))


def _vmem_capacity_bytes():
    try:
        return int(pltpu.get_tpu_info().vmem_capacity_bytes)
    except Exception:
        return 64 * 1024 * 1024  # conservative (v7x per-TC); safe on v5e/v6e too


def _resident_weight_bytes(d_in, h_pad, d_out, w_itemsize, weight_buffers):
    # weights in the operand dtype, biases always f32
    return weight_buffers * (
        (d_in * h_pad + h_pad * h_pad + h_pad * d_out) * w_itemsize
        + (2 * h_pad + d_out) * 4)


def _choose_row_tile(n_rows, d_in, h_pad, d_out, *, w_itemsize, x_itemsize,
                     op_itemsize, weight_buffers, budget_bytes):
    """Largest power-of-two row tile whose activations + resident weight slab fit."""
    row_align = 16 if op_itemsize == 2 else SUBLANE   # bf16 sublane pack factor
    w_bytes = _resident_weight_bytes(d_in, h_pad, d_out, w_itemsize, weight_buffers)
    tile = 1024
    while tile > row_align:
        act_bytes = (2 * tile * d_in * x_itemsize       # double-buffered input tile
                     + 2 * tile * d_out * x_itemsize    # double-buffered output tile
                     + 3 * tile * h_pad * 4             # live f32 intermediates
                     + 2 * tile * h_pad * op_itemsize)  # narrow copies fed to the MXU
        if w_bytes + act_bytes <= budget_bytes:
            break
        tile //= 2
    tile = max(row_align, min(tile, _round_up(n_rows, row_align)))
    # Keep >=2 grid steps whenever possible so dimension_semantics=("parallel",)
    # can shard rows across v7x's two TensorCores.
    if n_rows >= 2 * row_align:
        tile = min(tile, _round_up(-(-n_rows // 2), row_align))
    return tile


# ----------------------------------------------------------------------------
# probe: is single-buffering (pl.Buffered(1)) of resident operands supported?
# ----------------------------------------------------------------------------
def _copy_kernel(x_ref, o_ref):
    o_ref[...] = x_ref[...]


_SINGLE_BUF_OK = None


def _single_buffer_supported():
    global _SINGLE_BUF_OK
    if _SINGLE_BUF_OK is None:
        try:
            spec = pl.BlockSpec((8, 128), lambda i: (0, 0),
                                pipeline_mode=pl.Buffered(1))
            fn = pl.pallas_call(
                _copy_kernel,
                grid=(2,),
                in_specs=[spec],
                out_specs=pl.BlockSpec((8, 128), lambda i: (i, 0)),
                out_shape=jax.ShapeDtypeStruct((16, 128), jnp.float32),
            )
            xp = jnp.arange(8 * 128, dtype=jnp.float32).reshape(8, 128)
            out = jax.block_until_ready(fn(xp))
            _SINGLE_BUF_OK = bool(jnp.array_equal(out[:8], xp)
                                  and jnp.array_equal(out[8:], xp))
        except Exception:
            _SINGLE_BUF_OK = False
    return _SINGLE_BUF_OK


# ----------------------------------------------------------------------------
# fused FeedForward_q kernel
# ----------------------------------------------------------------------------
def _make_ffq_kernel(op_dtype, approx_gelu):
    act = (lambda v: jax.nn.gelu(v, approximate=True)) if approx_gelu else _gelu_exact

    def kernel(x_ref, w1_ref, b1_ref, w2_ref, b2_ref, w3_ref, b3_ref, o_ref):
        # Linear -> GELU -> (Dropout = identity) -> Linear -> GELU -> Linear
        # Matmul operands in op_dtype (bf16 by default), accumulation / bias /
        # GELU in f32 (v5e VPU/EUP have no bf16).
        x = x_ref[...].astype(op_dtype)
        h = jnp.dot(x, w1_ref[...], preferred_element_type=jnp.float32) + b1_ref[...]
        h = act(h)
        h = jnp.dot(h.astype(op_dtype), w2_ref[...],
                    preferred_element_type=jnp.float32) + b2_ref[...]
        h = act(h)
        h = jnp.dot(h.astype(op_dtype), w3_ref[...],
                    preferred_element_type=jnp.float32) + b3_ref[...]
        o_ref[...] = h.astype(o_ref.dtype)

    return kernel


def feedforward_q(x, params, *, approx_gelu=True):
    """x: (..., dim); params from prep_ffq_params (hidden dim lane-padded).

    Operand dtype is taken from the stored weights (bf16 by default)."""
    dim = x.shape[-1]
    w1, b1, w2, b2, w3, b3 = (params[k] for k in ("w1", "b1", "w2", "b2", "w3", "b3"))
    d_in, h_pad = w1.shape
    d_out = w3.shape[1]
    if d_in != dim or d_out != dim:
        raise ValueError(f"params built for dim={d_in}->{d_out}, got x dim={dim}")

    lead = x.shape[:-1]
    n = math.prod(lead) if lead else 1
    x2d = x.reshape(n, dim)                 # no dtype cast, no padding here

    op_dtype = w1.dtype
    op_itemsize = jnp.dtype(op_dtype).itemsize
    x_itemsize = jnp.dtype(x.dtype).itemsize

    capacity = _vmem_capacity_bytes()
    budget = int(capacity * 0.70)
    vmem_limit = int(capacity * 0.90)

    single_buf = _single_buffer_supported()
    weight_buffers = 1 if single_buf else 2
    w_resident = _resident_weight_bytes(d_in, h_pad, d_out, op_itemsize, weight_buffers)
    if w_resident > budget:
        # TODO(synk): pipeline w2/w3 from HBM (pltpu.emit_pipeline) or add a
        # feature-tiled grid axis for FFNs whose weights exceed VMEM.
        raise ValueError(
            f"FFN weights ({w_resident/2**20:.1f} MiB resident) exceed the VMEM "
            f"budget ({budget/2**20:.1f} MiB); weight tiling not implemented.")

    tile = _choose_row_tile(n, d_in, h_pad, d_out,
                            w_itemsize=op_itemsize, x_itemsize=x_itemsize,
                            op_itemsize=op_itemsize,
                            weight_buffers=weight_buffers, budget_bytes=budget)
    grid = (pl.cdiv(n, tile),)

    def resident(shape):
        if single_buf:
            return pl.BlockSpec(shape, lambda i: (0, 0), pipeline_mode=pl.Buffered(1))
        return pl.BlockSpec(shape, lambda i: (0, 0))

    out = pl.pallas_call(
        _make_ffq_kernel(op_dtype, approx_gelu),
        grid=grid,
        out_shape=jax.ShapeDtypeStruct((n, d_out), x.dtype),
        in_specs=[pl.BlockSpec((tile, d_in), lambda i: (i, 0)),
                  resident(w1.shape), resident(b1.shape),
                  resident(w2.shape), resident(b2.shape),
                  resident(w3.shape), resident(b3.shape)],
        out_specs=pl.BlockSpec((tile, d_out), lambda i: (i, 0)),
        compiler_params=pltpu.CompilerParams(
            dimension_semantics=("parallel",),
            vmem_limit_bytes=vmem_limit),
    )(x2d, w1, b1, w2, b2, w3, b3)

    return out.reshape(x.shape)


# ----------------------------------------------------------------------------
# parameters: torch-style Linear init, stored (in, out); hidden dim lane-padded
# ----------------------------------------------------------------------------
def init_ffq_params(key, dim, hidden_dim):
    h2 = 2 * hidden_dim
    ks = jax.random.split(key, 3)

    def lin(k, fan_in, fan_out):
        bound = 1.0 / math.sqrt(fan_in)
        kw, kb = jax.random.split(k)
        w = jax.random.uniform(kw, (fan_in, fan_out), jnp.float32, -bound, bound)
        b = jax.random.uniform(kb, (fan_out,), jnp.float32, -bound, bound)
        return w, b

    w1, b1 = lin(ks[0], dim, h2)
    w2, b2 = lin(ks[1], h2, h2)
    w3, b3 = lin(ks[2], h2, dim)
    return dict(w1=w1, b1=b1, w2=w2, b2=b2, w3=w3, b3=b3)


def prep_ffq_params(p, *, weight_dtype=jnp.bfloat16):
    """Zero-pad the hidden dim to a multiple of 128 (exact) and cast weights to
    the MXU operand dtype; biases stay f32."""
    dim, h2 = p["w1"].shape
    h_pad = _round_up(h2, LANE)

    def padw(w, rows, cols):
        w = jnp.pad(w, ((0, rows - w.shape[0]), (0, cols - w.shape[1])))
        return w.astype(weight_dtype)

    def padb(b, cols):
        return jnp.pad(b, (0, cols - b.shape[0])).reshape(1, cols).astype(jnp.float32)

    return dict(
        w1=padw(p["w1"], dim, h_pad), b1=padb(p["b1"], h_pad),
        w2=padw(p["w2"], h_pad, h_pad), b2=padb(p["b2"], h_pad),
        w3=padw(p["w3"], h_pad, dim), b3=padb(p["b3"], dim),
    )


# ----------------------------------------------------------------------------
# pure-JAX reference (unpadded, f32/erf) for correctness check
# ----------------------------------------------------------------------------
def feedforward_q_ref(x, p):
    h = _gelu_exact(x @ p["w1"] + p["b1"])
    h = _gelu_exact(h @ p["w2"] + p["b2"])
    return h @ p["w3"] + p["b3"]


# ----------------------------------------------------------------------------
if __name__ == "__main__":
    B, L = 2, 16          # batch, tokens
    DIM = 32              # model dim
    HIDDEN = 32           # hidden_dim (net uses hidden_dim * 2 = 64)

    root = jax.random.PRNGKey(0)
    k_par, k_x = jax.random.split(root)

    raw_params = init_ffq_params(k_par, DIM, HIDDEN)
    x = jax.random.normal(k_x, (B, L, DIM), jnp.float32)

    _single_buffer_supported()   # warm the Buffered(1) probe outside jit

    # performance-default path: bf16 MXU operands + tanh GELU
    params_bf16 = prep_ffq_params(raw_params, weight_dtype=jnp.bfloat16)
    fwd_fast = jax.jit(lambda xx, pp: feedforward_q(xx, pp, approx_gelu=True))
    y_fast = jax.block_until_ready(fwd_fast(x, params_bf16))

    # exact-parity path: f32 operands + erf GELU (matches torch nn.GELU default)
    params_f32 = prep_ffq_params(raw_params, weight_dtype=jnp.float32)
    fwd_exact = jax.jit(lambda xx, pp: feedforward_q(xx, pp, approx_gelu=False))
    y_exact = jax.block_until_ready(fwd_exact(x, params_f32))

    # TODO(synk): dropout is eval-mode identity; training-mode dropout masks are
    # not implemented in the fused kernel.
    y_ref = feedforward_q_ref(x, raw_params)
    assert y_exact.shape == (B, L, DIM), y_exact.shape
    assert y_fast.shape == (B, L, DIM), y_fast.shape
    assert jnp.all(jnp.isfinite(y_exact)) and jnp.all(jnp.isfinite(y_fast))
    assert jnp.allclose(y_exact, y_ref, rtol=1e-4, atol=1e-5), \
        float(jnp.max(jnp.abs(y_exact - y_ref)))
    assert jnp.allclose(y_fast, y_ref, rtol=5e-2, atol=1e-1), \
        float(jnp.max(jnp.abs(y_fast - y_ref)))
    print("KERNEL_OK")
</pallas_src>

<mosaic_0001>
module attributes {stable_mosaic.version = 11 : i64} {
  func.func @_copy_kernel(%arg0: i32, %arg1: memref<8x128xf32, #tpu.memory_space<vmem>>, %arg2: memref<8x128xf32, #tpu.memory_space<vmem>>) attributes {dimension_semantics = [#tpu.dimension_semantics<arbitrary>], iteration_bounds = array<i64: 2>, scalar_prefetch = 0 : i64, scratch_operands = 0 : i64, tpu.core_type = #tpu.core_type<tc>, window_params = [{pipeline_mode = #tpu.pipeline_mode<synchronous>, transform_indices = @transform_0, window_bounds = array<i64: 8, 128>}, {transform_indices = @transform_1, window_bounds = array<i64: 8, 128>}]} {
    %c0 = arith.constant 0 : index
    %c0_0 = arith.constant 0 : index
    %0 = vector.load %arg1[%c0, %c0_0] : memref<8x128xf32, #tpu.memory_space<vmem>>, vector<8x128xf32>
    %c0_1 = arith.constant 0 : index
    %c0_2 = arith.constant 0 : index
    %1 = vector.load %arg2[%c0_1, %c0_2] : memref<8x128xf32, #tpu.memory_space<vmem>>, vector<8x128xf32>
    tpu.vector_store %arg2[%c0_1, %c0_2], %0 {strides = array<i32>} : memref<8x128xf32, #tpu.memory_space<vmem>>, vector<8x128xf32>,
    return
  }
  func.func @transform_0(%arg0: i32) -> (i32, i32) {
    %c0_i32 = arith.constant 0 : i32
    %c0_i32_0 = arith.constant 0 : i32
    %c0_i32_1 = arith.constant 0 : i32
    return %c0_i32, %c0_i32_0 : i32, i32
  }
  func.func @transform_1(%arg0: i32) -> (i32, i32) {
    %c0_i32 = arith.constant 0 : i32
    %c0_i32_0 = arith.constant 0 : i32
    return %arg0, %c0_i32 : i32, i32
  }
}

module attributes {stable_mosaic.version = 11 : i64} {
  func.func @kernel(%arg0: i32, %arg1: memref<16x32xf32, #tpu.memory_space<vmem>>, %arg2: memref<32x128xbf16, #tpu.memory_space<vmem>>, %arg3: memref<1x128xf32, #tpu.memory_space<vmem>>, %arg4: memref<128x128xbf16, #tpu.memory_space<vmem>>, %arg5: memref<1x128xf32, #tpu.memory_space<vmem>>, %arg6: memref<128x32xbf16, #tpu.memory_space<vmem>>, %arg7: memref<1x32xf32, #tpu.memory_space<vmem>>, %arg8: memref<16x32xf32, #tpu.memory_space<vmem>>) attributes {dimension_semantics = [#tpu.dimension_semantics<parallel>], iteration_bounds = array<i64: 2>, scalar_prefetch = 0 : i64, scratch_operands = 0 : i64, tpu.core_type = #tpu.core_type<tc>, window_params = [{transform_indices = @transform_0, window_bounds = array<i64: 16, 32>}, {pipeline_mode = #tpu.pipeline_mode<synchronous>, transform_indices = @transform_1, window_bounds = array<i64: 32, 128>}, {pipeline_mode = #tpu.pipeline_mode<synchronous>, transform_indices = @transform_2, window_bounds = array<i64: 1, 128>}, {pipeline_mode = #tpu.pipeline_mode<synchronous>, transform_indices = @transform_3, window_bounds = array<i64: 128, 128>}, {pipeline_mode = #tpu.pipeline_mode<synchronous>, transform_indices = @transform_4, window_bounds = array<i64: 1, 128>}, {pipeline_mode = #tpu.pipeline_mode<synchronous>, transform_indices = @transform_5, window_bounds = array<i64: 128, 32>}, {pipeline_mode = #tpu.pipeline_mode<synchronous>, transform_indices = @transform_6, window_bounds = array<i64: 1, 32>}, {transform_indices = @transform_7, window_bounds = array<i64: 16, 32>}]} {
    %c0 = arith.constant 0 : index
    %c0_0 = arith.constant 0 : index
    %0 = vector.load %arg1[%c0, %c0_0] : memref<16x32xf32, #tpu.memory_space<vmem>>, vector<16x32xf32>
    %1 = arith.truncf %0 : vector<16x32xf32> to vector<16x32xbf16>
    %c0_1 = arith.constant 0 : index
    %c0_2 = arith.constant 0 : index
    %2 = vector.load %arg2[%c0_1, %c0_2] : memref<32x128xbf16, #tpu.memory_space<vmem>>, vector<32x128xbf16>
    %cst = arith.constant dense<0.000000e+00> : vector<16x128xf32>
    %3 = tpu.matmul %1, %2, %cst {dimension_numbers = #tpu.dot_dimension_numbers<[1], [0], [0], [1], [0, 0, 1, 1], [], []>} : vector<16x32xbf16>, vector<32x128xbf16>, vector<16x128xf32> -> vector<16x128xf32>
    %c0_3 = arith.constant 0 : index
    %c0_4 = arith.constant 0 : index
    %4 = vector.load %arg3[%c0_3, %c0_4] : memref<1x128xf32, #tpu.memory_space<vmem>>, vector<1x128xf32>
    %5 = vector.broadcast %4 : vector<1x128xf32> to vector<16x128xf32>
    %6 = arith.addf %3, %5 : vector<16x128xf32>
    %7 = arith.mulf %6, %6 : vector<16x128xf32>
    %8 = arith.mulf %6, %7 : vector<16x128xf32>
    %cst_5 = arith.constant 4.471500e-02 : f32
    %9 = vector.broadcast %cst_5 : f32 to vector<16x128xf32>
    %10 = arith.mulf %9, %8 : vector<16x128xf32>
    %11 = arith.addf %6, %10 : vector<16x128xf32>
    %cst_6 = arith.constant 0.797884583 : f32
    %12 = vector.broadcast %cst_6 : f32 to vector<16x128xf32>
    %13 = arith.mulf %12, %11 : vector<16x128xf32>
    %14 = math.tanh %13 : vector<16x128xf32>
    %cst_7 = arith.constant 1.000000e+00 : f32
    %15 = vector.broadcast %cst_7 : f32 to vector<16x128xf32>
    %16 = arith.addf %15, %14 : vector<16x128xf32>
    %cst_8 = arith.constant 5.000000e-01 : f32
    %17 = vector.broadcast %cst_8 : f32 to vector<16x128xf32>
    %18 = arith.mulf %17, %16 : vector<16x128xf32>
    %19 = arith.mulf %6, %18 : vector<16x128xf32>
    %20 = arith.truncf %19 : vector<16x128xf32> to vector<16x128xbf16>
    %c0_9 = arith.constant 0 : index
    %c0_10 = arith.constant 0 : index
    %21 = vector.load %arg4[%c0_9, %c0_10] : memref<128x128xbf16, #tpu.memory_space<vmem>>, vector<128x128xbf16>
    %cst_11 = arith.constant dense<0.000000e+00> : vector<16x128xf32>
    %22 = tpu.matmul %20, %21, %cst_11 {dimension_numbers = #tpu.dot_dimension_numbers<[1], [0], [0], [1], [0, 0, 1, 1], [], []>} : vector<16x128xbf16>, vector<128x128xbf16>, vector<16x128xf32> -> vector<16x128xf32>
    %c0_12 = arith.constant 0 : index
    %c0_13 = arith.constant 0 : index
    %23 = vector.load %arg5[%c0_12, %c0_13] : memref<1x128xf32, #tpu.memory_space<vmem>>, vector<1x128xf32>
    %24 = vector.broadcast %23 : vector<1x128xf32> to vector<16x128xf32>
    %25 = arith.addf %22, %24 : vector<16x128xf32>
    %26 = arith.mulf %25, %25 : vector<16x128xf32>
    %27 = arith.mulf %25, %26 : vector<16x128xf32>
    %cst_14 = arith.constant 4.471500e-02 : f32
    %28 = vector.broadcast %cst_14 : f32 to vector<16x128xf32>
    %29 = arith.mulf %28, %27 : vector<16x128xf32>
    %30 = arith.addf %25, %29 : vector<16x128xf32>
    %cst_15 = arith.constant 0.797884583 : f32
    %31 = vector.broadcast %cst_15 : f32 to vector<16x128xf32>
    %32 = arith.mulf %31, %30 : vector<16x128xf32>
    %33 = math.tanh %32 : vector<16x128xf32>
    %cst_16 = arith.constant 1.000000e+00 : f32
    %34 = vector.broadcast %cst_16 : f32 to vector<16x128xf32>
    %35 = arith.addf %34, %33 : vector<16x128xf32>
    %cst_17 = arith.constant 5.000000e-01 : f32
    %36 = vector.broadcast %cst_17 : f32 to vector<16x128xf32>
    %37 = arith.mulf %36, %35 : vector<16x128xf32>
    %38 = arith.mulf %25, %37 : vector<16x128xf32>
    %39 = arith.truncf %38 : vector<16x128xf32> to vector<16x128xbf16>
    %c0_18 = arith.constant 0 : index
    %c0_19 = arith.constant 0 : index
    %40 = vector.load %arg6[%c0_18, %c0_19] : memref<128x32xbf16, #tpu.memory_space<vmem>>, vector<128x32xbf16>
    %cst_20 = arith.constant dense<0.000000e+00> : vector<16x32xf32>
    %41 = tpu.matmul %39, %40, %cst_20 {dimension_numbers = #tpu.dot_dimension_numbers<[1], [0], [0], [1], [0, 0, 1, 1], [], []>} : vector<16x128xbf16>, vector<128x32xbf16>, vector<16x32xf32> -> vector<16x32xf32>
    %c0_21 = arith.constant 0 : index
    %c0_22 = arith.constant 0 : index
    %42 = vector.load %arg7[%c0_21, %c0_22] : memref<1x32xf32, #tpu.memory_space<vmem>>, vector<1x32xf32>
    %43 = vector.broadcast %42 : vector<1x32xf32> to vector<16x32xf32>
    %44 = arith.addf %41, %43 : vector<16x32xf32>
    %c0_23 = arith.constant 0 : index
    %c0_24 = arith.constant 0 : index
    %45 = vector.load %arg8[%c0_23, %c0_24] : memref<16x32xf32, #tpu.memory_space<vmem>>, vector<16x32xf32>
    tpu.vector_store %arg8[%c0_23, %c0_24], %44 {strides = array<i32>} : memref<16x32xf32, #tpu.memory_space<vmem>>, vector<16x32xf32>,
    return
  }
  func.func @transform_0(%arg0: i32) -> (i32, i32) {
    %c0_i32 = arith.constant 0 : i32
    %c0_i32_0 = arith.constant 0 : i32
    return %arg0, %c0_i32 : i32, i32
  }
  func.func @transform_1(%arg0: i32) -> (i32, i32) {
    %c0_i32 = arith.constant 0 : i32
    %c0_i32_0 = arith.constant 0 : i32
    %c0_i32_1 = arith.constant 0 : i32
    return %c0_i32, %c0_i32_0 : i32, i32
  }
  func.func @transform_2(%arg0: i32) -> (i32, i32) {
    %c0_i32 = arith.constant 0 : i32
    %c0_i32_0 = arith.constant 0 : i32
    %c0_i32_1 = arith.constant 0 : i32
    return %c0_i32, %c0_i32_0 : i32, i32
  }
  func.func @transform_3(%arg0: i32) -> (i32, i32) {
    %c0_i32 = arith.constant 0 : i32
    %c0_i32_0 = arith.constant 0 : i32
    %c0_i32_1 = arith.constant 0 : i32
    return %c0_i32, %c0_i32_0 : i32, i32
  }
  func.func @transform_4(%arg0: i32) -> (i32, i32) {
    %c0_i32 = arith.constant 0 : i32
    %c0_i32_0 = arith.constant 0 : i32
    %c0_i32_1 = arith.constant 0 : i32
    return %c0_i32, %c0_i32_0 : i32, i32
  }
  func.func @transform_5(%arg0: i32) -> (i32, i32) {
    %c0_i32 = arith.constant 0 : i32
    %c0_i32_0 = arith.constant 0 : i32
    %c0_i32_1 = arith.constant 0 : i32
    return %c0_i32, %c0_i32_0 : i32, i32
  }
  func.func @transform_6(%arg0: i32) -> (i32, i32) {
    %c0_i32 = arith.constant 0 : i32
    %c0_i32_0 = arith.constant 0 : i32
    %c0_i32_1 = arith.constant 0 : i32
    return %c0_i32, %c0_i32_0 : i32, i32
  }
  func.func @transform_7(%arg0: i32) -> (i32, i32) {
    %c0_i32 = arith.constant 0 : i32
    %c0_i32_0 = arith.constant 0 : i32
    return %arg0, %c0_i32 : i32, i32
  }
}

</mosaic_0001>

<bundles_post_ra>
// kernel: tpu_custom_call.1
= control target key start
LH: loop header
LB: loop body
LE: loop exit
PB: predicated region body
PF: predicated region fallthrough
CT: control target
= control target key end

     0   :  { %6 = vsyncpa [#allocation3], 0  ;;  %s440_s0 = inlined_call_operand.hbm [shape: f32[8,128], index: 0, kind: input, shape index: {}]   ;;  %s441_s1 = inlined_call_operand.hbm [shape: f32[16,128], index: 1, kind: output, shape index: {}]  }
   0x1   :  { %7 = vsyncpa [#allocation4], 0 }
   0x2   :  { %9 = vsyncpa [#allocation4 + $0x1], 0  ;;  %s356_s6 = smov 0   ;;  %s358_s7 = smov 0  }
   0x3   :  { %s360_s8 = smov 0   ;;  %s362_s9 = smov 0  }
   0x4 LB: > { %s377_s10 = sadd.s32 4294967295, %s343_s9   ;;  %s187_s11 = sadd.s32 4294967294, %s343_s9   ;;  %s343_s9 = sphi %s362_s9, %s447_s9   ;;  %s339_s8 = sphi %s360_s8, %s446_s8   ;;  %s335_s7 = sphi %s358_s7, %s445_s7   ;;  %s331_s6 = sphi %s356_s6, %s444_s6  }
   0x5   : > { %s381_s12 = sadd.s32 1, %s343_s9   ;;  %s43_s13 = sadd.s32 1, %s339_s8 }
   0x6   : > { %s40_s14 = ssub.s32 %s343_s9, %s381_s12  ;;  %p53_p0 = scmp.ne.s32.totalorder %s339_s8, %s335_s7 }
   0x7   : > { %p41_p1 = scmp.eq.s32.totalorder %s40_s14, 0  ;;  %p54_p2 = scmp.eq.s32.totalorder %s377_s10, 1 }
   0x8   : > { %p59_p3 = scmp.ne.s32.totalorder %s335_s7, %s331_s6  ;;  %p60_p4 = scmp.eq.s32.totalorder %s187_s11, 1 }
   0x9   : > { %s392_s15 = scalar_select %p41_p1, %s339_s8, %s43_s13  }
   0xa   : > { %p394_p5 = por %p54_p2, %p53_p0  ;;  %p398_p6 = por %p60_p4, %p59_p3 }
   0xb   : > { %p188_p7 = scmp.ge.s32.totalorder %s343_s9, 1  ;;  %p67_p8 = scmp.lt.s32.totalorder %s343_s9, 3 }
   0xc   : > { %p211_p9 = scmp.eq.s32.totalorder %s377_s10, 0  ;;  %s79_s20 = sshll.u32 %s440_s0, 4  ;;  %s80_s20 = int_to_ptr.hbm [resolvable:$true] %s79_s20 }
   0xd   : > { %p68_p10 = pnand %p188_p7, %p67_p8  ;;  %s345_s21 = smov [#allocation2]  }
   0xe   : > { %s81_s22 = sshll.u32 %s345_s21, 4  ;;  %s82_s22 = int_to_ptr.vmem [resolvable:$true] %s81_s22 }
   0xf   : > { %p203_p11 = pneg %p68_p10  ;;  %94 = sbr.rel (%p68_p10) target bundleno = 37 (0x25), region = 24 }
  0x11   : > { %p204_p12 = pnand %p211_p9, %p203_p11 }
  0x13   : > { %206 = dma.hbm_to_vmem [thread:$0]  (!%p204_p12), %s80_s20, 128, %s82_s22, [#allocation3]  }
  0x14   : > { %322 = dma.done.wait (%p211_p9), [#allocation3], 128  }
  0x15   : > { %324 = vsyncadd (%p211_p9), [#allocation3], 4294967168  ;;  %s107_s23 = sand.u32 1, %s335_s7   ;;  %s194_s24 = sshll.u32 %s377_s10, 3  ;;  %v110_v0 = vld [vmem:[#allocation2] sm:$0xff] }
  0x16   : > { %s192_s25 = sshll.u32 %s107_s23, 3  ;;  %s123_s28 = scalar_lea.hbm %s441_s1, %s194_s24 }
  0x17   : > { %s109_s29 = scalar_lea.vmem [#allocation5], %s192_s25  ;;  %s127_s2 = sshll.u32 %s123_s28, 4  ;;  %s128_s2 = int_to_ptr.hbm [resolvable:$true] %s127_s2 }
  0x18   : > { %s125_s30 = sshll.u32 %s109_s29, 4  ;;  %111 = vst [vmem:[%s109_s29] sm:$0xff] %v110_v0  ;;  %s113_s3 = scalar_lea.sflag [#allocation4], %s107_s23  ;;  %s126_s30 = int_to_ptr.vmem [resolvable:$true] %s125_s30 }
  0x19   : > { %s291_s4 = sshra.s32 %s128_s2, 4  ;;  %s297_s13 = scalar_lea.hbm %s441_s1, 16  ;;  %s292_s4 = int_to_ptr.hbm [resolvable:$true] %s291_s4 }
  0x1a   : > { %s293_s5 = scalar_lea.hbm %s292_s4, 8  ;;  %p298_p2 = scmp.lt.s32.totalorder %s292_s4, %s441_s1 }
  0x1b   : > { %p294_p13 = scmp.ne.s32.totalorder %s292_s4, %s293_s5  ;;  %p299_p3 = scmp.lt.s32.totalorder %s297_s13, %s293_s5 }
  0x1d   : > { %p295_p0 = pnand %p294_p13, %p394_p5  ;;  %p300_p4 = por %p299_p3, %p298_p2 }
  0x1f   : > { %p296_p1 = pneg %p295_p0 }
  0x21   : > { %p301_p7 = pnand %p300_p4, %p296_p1 }
  0x23   : > { %304 = shalt.err (!%p301_p7)
}
  0x24   : > { %201 = dma.vmem_to_hbm [thread:$0]  (%p394_p5), %s126_s30, 128, %s128_s2, %s113_s3  }
  0x25 PF: > { %p213_p8 = scmp.ge.s32.totalorder %s343_s9, 2  ;;  %s139_s19 = sand.u32 1, %s331_s6  }
  0x26   : > { %s140_s20 = scalar_lea.sflag [#allocation4], %s139_s19 }
  0x27   : > { %p208_p9 = pnand %p213_p8, %p398_p6 }
  0x29   : > { %p209_p10 = pneg %p208_p9 }
  0x2b   : > { %326 = dma.done.wait (%p209_p10), %s140_s20, 128  }
  0x2c   : > { %328 = vsyncadd (%p209_p10), %s140_s20, 4294967168  ;;  %p12_p11 = scmp.ge.s32.totalorder %s381_s12, 4   ;;  %s444_s6 = smov %s335_s7 }
  0x2d   : > { %s445_s7 = smov %s339_s8  ;;  %s446_s8 = smov %s392_s15 }
  0x2e   : > { %s447_s9 = smov %s381_s12  ;;  %14 = sbr.rel (!%p12_p11) target bundleno = 4 (0x4), region = 61 }
  0x33   :  { %146 = vsyncpa [#allocation3], 1 }
  0x34   :  { %148 = vsyncpa [#allocation3 + $0x1], 1 }
  0x35   :  { %149 = vsyncpa [#allocation4], 1 }
  0x36   :  { %151 = vsyncpa [#allocation4 + $0x1], 1 }

// kernel: _lambda_.1
= control target key start
LH: loop header
LB: loop body
LE: loop exit
PB: predicated region body
PF: predicated region fallthrough
CT: control target
= control target key end

     0   :  { %12 = vsyncpa [#allocation3], 0  ;;  %s1143_s0 = inlined_call_operand.hbm [shape: f32[32,32], index: 0, kind: input, shape index: {}]   ;;  %s1144_s1 = inlined_call_operand.vmem [shape: bf16[32,128], index: 1, kind: input, shape index: {}]   ;;  %s1145_s2 = inlined_call_operand.vmem [shape: f32[1,128], index: 2, kind: input, shape index: {}]   ;;  %s1146_s3 = inlined_call_operand.vmem [shape: bf16[128,128], index: 3, kind: input, shape index: {}]   ;;  %s1147_s4 = inlined_call_operand.vmem [shape: f32[1,128], index: 4, kind: input, shape index: {}]   ;;  %s1148_s5 = inlined_call_operand.vmem [shape: bf16[128,32], index: 5, kind: input, shape index: {}]   ;;  %s1149_s6 = inlined_call_operand.vmem [shape: f32[1,32], index: 6, kind: input, shape index: {}]   ;;  %s1150_s7 = inlined_call_operand.hbm [shape: f32[32,32], index: 7, kind: output, shape index: {}]  }
   0x1   :  { %14 = vsyncpa [#allocation3 + $0x1], 0 }
   0x2   :  { %15 = vsyncpa [#allocation4], 0 }
   0x3   :  { %17 = vsyncpa [#allocation4 + $0x1], 0  ;;  %s946_s24 = smov 0   ;;  %s948_s25 = smov 0  }
   0x4   :  { %s950_s26 = smov 0   ;;  %s952_s27 = smov 0  }
   0x5 LB: > { %s967_s28 = sadd.s32 4294967295, %s900_s27   ;;  %s636_s29 = sadd.s32 4294967294, %s900_s27   ;;  %s900_s27 = sphi %s952_s27, %s1162_s27   ;;  %s896_s26 = sphi %s950_s26, %s1161_s26   ;;  %s892_s25 = sphi %s948_s25, %s1160_s25   ;;  %s888_s24 = sphi %s946_s24, %s1159_s24  }
   0x6   : > { %s971_s30 = sadd.s32 1, %s900_s27   ;;  %s30_s8 = sadd.s32 1, %s896_s26 }
   0x7   : > { %s27_s9 = ssub.s32 %s900_s27, %s971_s30  ;;  %p37_p0 = scmp.ne.s32.totalorder %s896_s26, %s892_s25 }
   0x8   : > { %p28_p1 = scmp.eq.s32.totalorder %s27_s9, 0  ;;  %p38_p2 = scmp.eq.s32.totalorder %s900_s27, 0 }
   0x9   : > { %p43_p3 = scmp.ne.s32.totalorder %s892_s25, %s888_s24  ;;  %p44_p4 = scmp.eq.s32.totalorder %s967_s28, 0 }
   0xa   : > { %s983_s10 = scalar_select %p28_p1, %s896_s26, %s30_s8  }
   0xb   : > { %p985_p5 = por %p38_p2, %p37_p0  ;;  %p989_p6 = por %p44_p4, %p43_p3 }
   0xc   : > { %1151 = sst [smem:[#allocation8_spill]] %s983_s10  ;;  %p193_p7 = scmp.eq.s32.totalorder %s967_s28, 1 }
   0xd   : > { %p199_p8 = scmp.eq.s32.totalorder %s636_s29, 1  ;;  %p755_p10 = scmp.lt.s32.totalorder %s900_s27, 2 }
   0xe   : > { %p996_p11 = por %p193_p7, %p37_p0  ;;  %s237_s15 = sand.u32 1, %s896_s26  }
   0xf   : > { %p1000_p12 = por %p199_p8, %p43_p3  ;;  %s723_s16 = sshll.u32 %s900_s27, 4 }
  0x10   : > { %s639_s17 = sshll.u32 %s237_s15, 4  ;;  %s246_s20 = scalar_lea.hbm %s1143_s0, %s723_s16 }
  0x11   : > { %s247_s21 = sshll.u32 %s246_s20, 4  ;;  %s241_s22 = scalar_lea.vmem [#allocation2], %s639_s17  ;;  %s248_s21 = int_to_ptr.hbm [resolvable:$true] %s247_s21 }
  0x12   : > { %s249_s23 = sshll.u32 %s241_s22, 4  ;;  %p1011_p13 = pnand %p755_p10, %p985_p5  ;;  %s250_s23 = int_to_ptr.vmem [resolvable:$true] %s249_s23 }
  0x13   : > { %p642_p0 = scmp.ge.s32.totalorder %s900_s27, 1  ;;  %p257_p1 = scmp.lt.s32.totalorder %s900_s27, 3 }
  0x14   : > { %s238_s8 = scalar_lea.sflag [#allocation3], %s237_s15  ;;  %s804_s9 = sshra.s32 %s248_s21, 4  ;;  %s805_s9 = int_to_ptr.hbm [resolvable:$true] %s804_s9 }
  0x15   : > { %s806_s10 = scalar_lea.hbm %s805_s9, 16  ;;  %p808_p3 = pneg %p1011_p13 }
  0x16   : > { %p807_p2 = scmp.ne.s32.totalorder %s805_s9, %s806_s10  ;;  %s811_s11 = scalar_lea.hbm %s1143_s0, 32 }
  0x17   : > { %p812_p5 = scmp.lt.s32.totalorder %s805_s9, %s1143_s0  ;;  %p813_p8 = scmp.lt.s32.totalorder %s811_s11, %s806_s10 }
  0x18   : > { %p809_p4 = pnand %p808_p3, %p807_p2 }
  0x19   : > { %p814_p10 = por %p813_p8, %p812_p5 }
  0x1a   : > { %p810_p7 = pneg %p809_p4 }
  0x1c   : > { %p815_p9 = pnand %p814_p10, %p810_p7 }
  0x1e   : > { %818 = shalt.err (!%p815_p9)
}
  0x1f   : > { %s902_s15 = smov 128   ;;  %s903_s20 = smov 8  }
  0x20   : > { %750 = dma.hbm_to_vmem [thread:$0]  (!%p1011_p13), %s248_s21, 256, %s250_s23, %s238_s8, %s902_s15, %s902_s15, %s903_s20  }
  0x21   : > { %p258_p2 = pnand %p642_p0, %p257_p1 }
  0x22   : > { %s1032_s22 = sand.u32 (!%p258_p2), 1, %s892_s25  }
  0x23   : > { %261 = sbr.rel (%p258_p2) target bundleno = 517 (0x205), region = 48  ;;  %s643_s10 = sshll.u32 (!%p258_p2), %s1032_s22, 4 }
  0x24   : > { %s264_s9 = scalar_lea.sflag (!%p258_p2), [#allocation3], %s1032_s22  ;;  %s267_s16 = scalar_lea.vmem (!%p258_p2), [#allocation2], %s643_s10 }
  0x28   : > { %879 = dma.done.wait (%p989_p6), %s264_s9, 256  }
  0x29   : > { %881 = vsyncadd (%p989_p6), %s264_s9, 4294967040  ;;  %v725_v0 = vld [vmem:[%s1144_s1 + $0x8] sm:$0xff]  ;;  %v724_v1 = vld [vmem:[%s1144_s1] sm:$0xff]  ;;  %vm325_vm0 = vcmask 261120   ;;  %s742_s8 = sshll.u32 %s967_s28, 4  ;;  %s298_s18 = scalar_lea.vmem [#allocation5], %s643_s10 }
  0x2a   : > { %v302_v2 = vld [vmem:[%s267_s16] sm:$0xff]  ;;  %335 = vmatpush.bf16.msra.mxu0 %v725_v0  ;;  %v303_v3 = vld [vmem:[%s267_s16 + $0x8] sm:$0xff]  ;;  %s559_s12 = scalar_lea.hbm %s1150_s7, %s742_s8  ;;  %s560_s19 = sshll.u32 %s298_s18, 4  ;;  %s561_s19 = int_to_ptr.vmem [resolvable:$true] %s560_s19 }
  0x2b   : > { %v304_v4 = vpack.c.bf16 %v303_v3, %v302_v2  ;;  %v733_v5 = vld [vmem:[%s1146_s3 + $0x38] sm:$0xff]  ;;  %v732_v6 = vld [vmem:[%s1146_s3 + $0x30] sm:$0xff]  ;;  %v731_v7 = vld [vmem:[%s1146_s3 + $0x28] sm:$0xff]  ;;  %s562_s15 = sshll.u32 %s559_s12, 4  ;;  %s548_s28 = scalar_lea.sflag [#allocation4], %s1032_s22  ;;  %s563_s15 = int_to_ptr.hbm [resolvable:$true] %s562_s15 }
  0x2c   : > { %430 = vmatpush.bf16.msra.mxu1 %v733_v5  ;;  %v730_v8 = vld [vmem:[%s1146_s3 + $0x20] sm:$0xff]  ;;  %v729_v9 = vld [vmem:[%s1146_s3 + $0x18] sm:$0xff]  ;;  %v728_v10 = vld [vmem:[%s1146_s3 + $0x10] sm:$0xff]  ;;  %s848_s20 = sshra.s32 %s563_s15, 4  ;;  %s854_s21 = scalar_lea.hbm %s1150_s7, 32  ;;  %s849_s20 = int_to_ptr.hbm [resolvable:$true] %s848_s20 }
  0x2d   : > { %v727_v11 = vld [vmem:[%s1146_s3 + $0x8] sm:$0xff]  ;;  %v793_v12 = vld [vmem:[%s1145_s2] ss:$0 sm:$0xff]  ;;  %v741_v37 = vld [vmem:[%s1148_s5 + $0x38] sm:$0xff]  ;;  %s850_s9 = scalar_lea.hbm %s849_s20, 16  ;;  %p855_p0 = scmp.lt.s32.totalorder %s849_s20, %s1150_s7 }
  0x2e   : > { %336 = vmatpush.bf16.msra.mxu0 %v724_v1  ;;  %v726_v13 = vld [vmem:[%s1146_s3] sm:$0xff]  ;;  %531 = vmatpush.bf16.msra.mxu2 %v741_v37  ;;  %v740_v38 = vld [vmem:[%s1148_s5 + $0x30] sm:$0xff]  ;;  %v739_v39 = vld [vmem:[%s1148_s5 + $0x28] sm:$0xff]  ;;  %p851_p6 = scmp.ne.s32.totalorder %s849_s20, %s850_s9  ;;  %p856_p1 = scmp.lt.s32.totalorder %s854_s21, %s850_s9 }
  0x2f   : > { %v738_v40 = vld [vmem:[%s1148_s5 + $0x20] sm:$0xff]  ;;  %v737_v41 = vld [vmem:[%s1148_s5 + $0x18] sm:$0xff]  ;;  %v736_v42 = vld [vmem:[%s1148_s5 + $0x10] sm:$0xff] }
  0x30   : > { %431 = vmatpush.bf16.msra.mxu1 %v732_v6  ;;  %v735_v43 = vld [vmem:[%s1148_s5 + $0x8] sm:$0xff]  ;;  %v794_v44 = vld [vmem:[%s1147_s4] ss:$0 sm:$0xff]  ;;  %p852_p9 = pnand %p851_p6, %p996_p11  ;;  %p857_p3 = por %p856_p1, %p855_p0 }
  0x31   : > { %653 = vmatmul.msk.bf16.vlgmr.msra.gmra.mxu0 %vm325_vm0, %v304_v4  ;;  %v734_v45 = vld [vmem:[%s1148_s5] sm:$0xff] }
  0x32   : > { %532 = vmatpush.bf16.msra.mxu2 %v740_v38  ;;  %v795_v5 = vld [vmem:[%s1149_s6] ss:$0 sm:$0xff]  ;;  %p853_p13 = pneg %p852_p9 }
  0x34   : > { %432 = vmatpush.bf16.msra.mxu1 %v731_v7  ;;  %p858_p4 = pnand %p857_p3, %p853_p13 }
  0x36   : > { %533 = vmatpush.bf16.msra.mxu2 %v739_v39 }
  0x38   : > { %433 = vmatpush.bf16.msra.mxu1 %v730_v8 }
  0x3a   : > { %534 = vmatpush.bf16.msra.mxu2 %v738_v40 }
  0x3c   : > { %434 = vmatpush.bf16.msra.mxu1 %v729_v9 }
  0x3e   : > { %535 = vmatpush.bf16.msra.mxu2 %v737_v41 }
  0x40   : > { %435 = vmatpush.bf16.msra.mxu1 %v728_v10 }
  0x42   : > { %536 = vmatpush.bf16.msra.mxu2 %v736_v42 }
  0x44   : > { %436 = vmatpush.bf16.msra.mxu1 %v727_v11 }
  0x46   : > { %537 = vmatpush.bf16.msra.mxu2 %v735_v43 }
  0x48   : > { %437 = vmatpush.bf16.msra.mxu1 %v726_v13 }
  0x4a   : > { %538 = vmatpush.bf16.msra.mxu2 %v734_v45 }
  0xae   : > { %v338_v14 = vpop.f32.mrf.mxu0 }
  0xaf   : > { %v339_v15 = vadd.f32 %v793_v12, %v338_v14 }
  0xb1   : > { %v343_v16 = vmul.f32 %v339_v15, %v339_v15 }
  0xb3   : > { %v345_v17 = vmul.f32 %v343_v16, %v339_v15 }
  0xb5   : > { %v347_v18 = vmul.f32 0.044715, %v345_v17 }
  0xb6   : > { %v340_v19 = vpop.f32.mrf.mxu0 }
  0xb7   : > { %v349_v20 = vadd.f32 %v347_v18, %v339_v15  ;;  %v341_v21 = vadd.f32 %v793_v12, %v340_v19 }
  0xb9   : > { %v344_v22 = vmul.f32 %v341_v21, %v341_v21  ;;  %v351_v23 = vmul.f32 0.7978846, %v349_v20 }
  0xbb   : > { %v346_v24 = vmul.f32 %v344_v22, %v341_v21  ;;  %796 = vtanh.f32 %v351_v23 }
  0xbd   : > { %v348_v25 = vmul.f32 0.044715, %v346_v24 }
  0xbf   : > { %v350_v26 = vadd.f32 %v348_v25, %v341_v21 }
  0xc1   : > { %v352_v27 = vmul.f32 0.7978846, %v350_v26  ;;  %v797_v28 = vpop.eup %796 }
  0xc2   : > { %v355_v29 = vadd.f32 1.0, %v797_v28 }
  0xc3   : > { %798 = vtanh.f32 %v352_v27 }
  0xc4   : > { %v357_v32 = vmul.f32 0.5, %v355_v29 }
  0xc6   : > { %v359_v34 = vmul.f32 %v357_v32, %v339_v15 }
  0xc9   : > { %v799_v30 = vpop.eup %798 }
  0xca   : > { %v356_v31 = vadd.f32 1.0, %v799_v30 }
  0xcc   : > { %v358_v33 = vmul.f32 0.5, %v356_v31 }
  0xce   : > { %v360_v35 = vmul.f32 %v358_v33, %v341_v21 }
  0xd0   : > { %v361_v36 = vpack.c.bf16 %v360_v35, %v359_v34 }
  0xd2   : > { %438 = vmatmul.bf16.vlgmr.msra.gmra.mxu1 %v361_v36 }
 0x14f   : > { %v439_v46 = vpop.f32.mrf.mxu1 }
 0x150   : > { %v440_v47 = vadd.f32 %v794_v44, %v439_v46 }
 0x152   : > { %v444_v48 = vmul.f32 %v440_v47, %v440_v47 }
 0x154   : > { %v446_v49 = vmul.f32 %v444_v48, %v440_v47 }
 0x156   : > { %v448_v50 = vmul.f32 0.044715, %v446_v49 }
 0x157   : > { %v441_v51 = vpop.f32.mrf.mxu1 }
 0x158   : > { %v450_v52 = vadd.f32 %v448_v50, %v440_v47  ;;  %v442_v53 = vadd.f32 %v794_v44, %v441_v51 }
 0x15a   : > { %v445_v54 = vmul.f32 %v442_v53, %v442_v53  ;;  %v452_v55 = vmul.f32 0.7978846, %v450_v52 }
 0x15c   : > { %v447_v56 = vmul.f32 %v445_v54, %v442_v53  ;;  %800 = vtanh.f32 %v452_v55 }
 0x15e   : > { %v449_v57 = vmul.f32 0.044715, %v447_v56 }
 0x160   : > { %v451_v58 = vadd.f32 %v449_v57, %v442_v53 }
 0x162   : > { %v453_v59 = vmul.f32 0.7978846, %v451_v58  ;;  %v801_v60 = vpop.eup %800 }
 0x163   : > { %v456_v61 = vadd.f32 1.0, %v801_v60 }
 0x164   : > { %802 = vtanh.f32 %v453_v59 }
 0x165   : > { %v458_v0 = vmul.f32 0.5, %v456_v61 }
 0x167   : > { %v460_v2 = vmul.f32 %v458_v0, %v440_v47 }
 0x16a   : > { %v803_v62 = vpop.eup %802 }
 0x16b   : > { %v457_v63 = vadd.f32 1.0, %v803_v62 }
 0x16d   : > { %v459_v1 = vmul.f32 0.5, %v457_v63 }
 0x16f   : > { %v461_v3 = vmul.f32 %v459_v1, %v442_v53 }
 0x171   : > { %v462_v4 = vpack.c.bf16 %v461_v3, %v460_v2 }
 0x173   : > { %539 = vmatmul.bf16.vlgmr.msra.gmra.mxu2 %v462_v4 }
 0x1f6   : > { %v540_v6 = vpop.f32.mrf.mxu2 }
 0x1f7   : > { %v541_v7 = vadd.f32 %v795_v5, %v540_v6 }
 0x1f9   : > { %545 = vst.msk [vmem:[%s298_s18] sm:$0xff] %vm325_vm0, %v541_v7 }
 0x1fe   : > { %v542_v8 = vpop.f32.mrf.mxu2 }
 0x1ff   : > { %v543_v9 = vadd.f32 %v795_v5, %v542_v8 }
 0x201   : > { %546 = vst.msk [vmem:[%s298_s18 + $0x8] sm:$0xff] %vm325_vm0, %v543_v9 }
 0x202   : > { %861 = shalt.err (!%p858_p4)
}
 0x203   : > { %s904_s22 = smov 128   ;;  %s905_s8 = smov 8  }
 0x204   : > { %745 = dma.vmem_to_hbm [thread:$0]  (%p996_p11), %s561_s19, 256, %s563_s15, %s548_s28, %s904_s22, %s904_s22, %s905_s8  }
 0x205 PF: > { %s577_s17 = sand.u32 1, %s888_s24   ;;  %p1157_p7 = scmp.ge.s32.totalorder %s900_s27, 2 }
 0x206   : > { %s578_s11 = scalar_lea.sflag [#allocation4], %s577_s17 }
 0x207   : > { %p752_p5 = pnand %p1157_p7, %p1000_p12 }
 0x209   : > { %p753_p8 = pneg %p752_p5 }
 0x20b   : > { %883 = dma.done.wait (%p753_p8), %s578_s11, 256  }
 0x20c   : > { %885 = vsyncadd (%p753_p8), %s578_s11, 4294967040  ;;  %s1158_s12 = sld [smem:[#allocation8_spill]]  ;;  %p20_p10 = scmp.ge.s32.totalorder %s971_s30, 4  }
 0x20d   : > { %s1159_s24 = smov %s892_s25  ;;  %s1160_s25 = smov %s896_s26 }
 0x20e   : > { %s1162_s27 = smov %s971_s30  ;;  %22 = sbr.rel (!%p20_p10) target bundleno = 5 (0x5), region = 93 }
 0x212   : > { %s1161_s26 = smov %s1158_s12 }
 0x213   :  { %584 = vsyncpa [#allocation3], 1 }
 0x214   :  { %586 = vsyncpa [#allocation3 + $0x1], 1 }
 0x215   :  { %587 = vsyncpa [#allocation4], 1 }
 0x216   :  { %589 = vsyncpa [#allocation4 + $0x1], 1 }

</bundles_post_ra>
